<compile_context>
chip_gen: v7x
topology: tpu7x:2x2x1
jax: 0.10.0
libtpu: 0.0.40
codegen_flags: <defaults>
</compile_context>

<pallas_src>
import functools
import math

import jax
import jax.numpy as jnp
from jax.experimental import pallas as pl
from jax.experimental.pallas import tpu as pltpu

KSIZE = 5
HALF = KSIZE // 2  # 2


# --------------------------------------------------------------------------- #
# Kernel
# --------------------------------------------------------------------------- #
def odefunc_im_kernel(y_ref, w_ref, o_ref):
    """One (TB, N) batch tile.

    y_ref: (TB, N) VMEM (native dtype), w_ref: (KSIZE,) SMEM f32 taps,
    o_ref: (TB, N) VMEM.  N stays whole in the lane dim, so the circular wrap
    is expressed as lane rotations (XLU) instead of padded / misaligned slices.
    """
    y = y_ref[...]                               # native dtype (no upcast before rolling)
    n = y.shape[-1]
    w = [w_ref[k] for k in range(KSIZE)]         # hoist the 5 SMEM scalar reads

    # out[b, i] = sum_k w[k] * y[b, (i + k - HALF) mod N]
    #           = sum_k w[k] * roll(y, shift=HALF - k, axis=lanes)[b, i]
    acc = w[HALF] * y.astype(jnp.float32)        # center tap: no rotation, f32 accumulate
    for k in range(KSIZE):
        if k == HALF:
            continue
        rolled = pltpu.roll(y, shift=(HALF - k) % n, axis=1)   # XLU, native dtype
        acc = acc + w[k] * rolled.astype(jnp.float32)          # VPU, f32 accumulate
    o_ref[...] = acc.astype(o_ref.dtype)


# --------------------------------------------------------------------------- #
# Tiling / budgeting helpers
# --------------------------------------------------------------------------- #
def _vmem_capacity():
    """Physical VMEM bytes (per TensorCore); conservative default if unavailable."""
    try:
        return int(pltpu.get_tpu_info().vmem_capacity_bytes)
    except Exception:
        return 64 << 20  # v7x per-TC capacity: the tightest generation


def _pallas_supported(batch, n, itemsize, vmem_cap):
    """Only take the Pallas path for lane-dense, VMEM-feasible shapes."""
    if n < 128 or n % 128 != 0:
        return False  # sub-/mis-aligned lane dim -> masked vst.msk stores; use XLA
    min_rows = batch if batch <= 8 else 8
    # double-buffered in+out tiles + f32 compute temporaries + headroom
    needed = 4 * min_rows * n * itemsize + 3 * min_rows * n * 4 + (2 << 20)
    return needed <= vmem_cap


def _batch_tile(batch, n, itemsize, vmem_cap):
    """Rows per batch tile.

    Per-buffer target is ~vmem/16 (clamped to [1 MiB, 8 MiB]) so the 4
    pipelined buffers plus f32 temporaries leave >50% headroom: ~8 MiB/buffer
    on 128 MiB chips (v5e/v6e), ~4 MiB on v7x's 64 MiB.  When the batch is big
    enough, keep >=4 grid steps so the pipeline has depth and v7x can shard
    the parallel batch axis across both TensorCores.
    """
    target = max(1 << 20, min(8 << 20, vmem_cap // 16))
    rows = max(8, (target // max(1, n * itemsize) // 8) * 8)
    if batch >= 32:
        rows = min(rows, max(8, (batch // 4 // 8) * 8))
    if rows >= batch or batch <= 8:
        return batch  # single full-batch tile (always a legal block shape)
    return rows


def _xla_fallback(y, w):
    """Plain-XLA circular 5-tap cross-correlation (for unsupported shapes)."""
    n = y.shape[1]
    yf = y.astype(jnp.float32)
    y_pad = jnp.concatenate([yf[:, n - HALF:], yf, yf[:, :HALF]], axis=1)
    out = jnp.zeros_like(yf)
    for k in range(KSIZE):
        out = out + w[k] * y_pad[:, k:k + n]
    return out.astype(y.dtype)


# --------------------------------------------------------------------------- #
# Public forward
# --------------------------------------------------------------------------- #
@functools.partial(jax.jit, static_argnames=("batch_tile",))
def ode_func_im_forward(t, y, weight, *, batch_tile=None):
    """Pallas equivalent of ODEFuncIM.forward(t, y).

    t is unused (signature parity). y: (B, N). weight: torch Conv1d weight of
    shape (1, 1, 5) (any shape with 5 elements accepted).
    """
    del t
    B, N = y.shape
    w = weight.reshape(KSIZE).astype(jnp.float32)
    itemsize = y.dtype.itemsize
    vmem_cap = _vmem_capacity()

    if not _pallas_supported(B, N, itemsize, vmem_cap):
        # TODO(synk): add an N-tiled Pallas path with a 2-lane circular halo for
        # lane-misaligned or huge-N shapes; plain XLA handles them for now.
        return _xla_fallback(y, w)

    tb = batch_tile if batch_tile is not None else _batch_tile(B, N, itemsize, vmem_cap)
    tile_bytes = tb * N * itemsize
    # Explicit scoped-VMEM budget: double-buffered in+out tiles + f32 temporaries.
    needed = 4 * tile_bytes + 3 * tb * N * 4 + (2 << 20)
    vmem_limit = int(min(vmem_cap, max(32 << 20, needed)))

    return pl.pallas_call(
        odefunc_im_kernel,
        out_shape=jax.ShapeDtypeStruct((B, N), y.dtype),
        grid=(pl.cdiv(B, tb),),                 # partial last block is fine: rows independent
        in_specs=[
            pl.BlockSpec((tb, N), lambda i: (i, 0)),             # batch tile, N whole in lanes
            pl.BlockSpec(memory_space=pltpu.MemorySpace.SMEM),   # 5 scalar taps
        ],
        out_specs=pl.BlockSpec((tb, N), lambda i: (i, 0)),
        compiler_params=pltpu.CompilerParams(
            dimension_semantics=("parallel",),  # lets v7x split batch tiles across both TCs
            vmem_limit_bytes=vmem_limit,
        ),
        cost_estimate=pl.CostEstimate(
            flops=9 * B * N,                    # 5 muls + 4 adds per output
            transcendentals=0,
            bytes_accessed=2 * B * N * itemsize,
        ),
    )(y, w)


# --------------------------------------------------------------------------- #
# Reference & params
# --------------------------------------------------------------------------- #
def ode_func_im_reference(t, y, weight):
    """Pure-JAX reference (circular pad + 5-tap cross-correlation), matching PyTorch."""
    del t
    n = y.shape[1]
    w = weight.reshape(KSIZE).astype(jnp.float32)
    yf = y.astype(jnp.float32)
    y_pad = jnp.concatenate([yf[:, n - HALF:], yf, yf[:, :HALF]], axis=1)
    out = jnp.zeros_like(yf)
    for k in range(KSIZE):
        out = out + w[k] * y_pad[:, k:k + n]
    return out


def init_params(key):
    """Matches nn.init.uniform_(weight, -sqrt(1/3), sqrt(1/3)); shape = torch Conv1d weight."""
    bound = math.sqrt(1.0 / 3.0)
    return jax.random.uniform(
        key, (1, 1, KSIZE), dtype=jnp.float32, minval=-bound, maxval=bound
    )
    # TODO(synk): the `fixed_linear` constructor path just overwrites this weight with the
    # finite-difference stencil K; pass that array as `weight` to get identical behavior.


# --------------------------------------------------------------------------- #
# Self-test
# --------------------------------------------------------------------------- #
if __name__ == "__main__":
    key = jax.random.PRNGKey(0)
    k_w, k_y1, k_y2, k_y3 = jax.random.split(key, 4)

    weight = init_params(k_w)          # (1, 1, 5)
    t = jnp.float32(0.0)               # unused, signature parity with forward(t, y)

    # Case 1: small aligned shape (single batch tile).
    B1, N1 = 8, 256
    y1 = jax.random.normal(k_y1, (B1, N1), dtype=jnp.float32)
    out1 = jax.block_until_ready(ode_func_im_forward(t, y1, weight))
    ref1 = ode_func_im_reference(t, y1, weight)
    assert out1.shape == (B1, N1)
    assert jnp.allclose(out1, ref1, atol=1e-5, rtol=1e-5), "mismatch vs reference (case 1)"

    # Case 2: multi-tile grid with a partial last batch block (pipelined path).
    B2, N2 = 20, 128
    y2 = jax.random.normal(k_y2, (B2, N2), dtype=jnp.float32)
    out2 = jax.block_until_ready(ode_func_im_forward(t, y2, weight, batch_tile=8))
    ref2 = ode_func_im_reference(t, y2, weight)
    assert out2.shape == (B2, N2)
    assert jnp.allclose(out2, ref2, atol=1e-5, rtol=1e-5), "mismatch vs reference (case 2)"

    # Case 3: N not a multiple of 128 takes the documented XLA fallback path.
    B3, N3 = 4, 100
    y3 = jax.random.normal(k_y3, (B3, N3), dtype=jnp.float32)
    out3 = jax.block_until_ready(ode_func_im_forward(t, y3, weight))
    ref3 = ode_func_im_reference(t, y3, weight)
    assert out3.shape == (B3, N3)
    assert jnp.allclose(out3, ref3, atol=1e-5, rtol=1e-5), "mismatch vs reference (case 3)"

    print("KERNEL_OK")
</pallas_src>

<mosaic_0001>
module attributes {stable_mosaic.version = 11 : i64} {
  func.func @odefunc_im_kernel(%arg0: i32, %arg1: memref<8x256xf32, #tpu.memory_space<vmem>>, %arg2: memref<5xf32, #tpu.memory_space<smem>>, %arg3: memref<8x256xf32, #tpu.memory_space<vmem>>) attributes {dimension_semantics = [#tpu.dimension_semantics<parallel>], iteration_bounds = array<i64: 1>, scalar_prefetch = 0 : i64, scratch_operands = 0 : i64, tpu.core_type = #tpu.core_type<tc>, window_params = [{transform_indices = @transform_0, window_bounds = array<i64: 8, 256>}, {transform_indices = @transform_1, window_bounds = array<i64: 5>}, {transform_indices = @transform_2, window_bounds = array<i64: 8, 256>}]} {
    %c0 = arith.constant 0 : index
    %c0_0 = arith.constant 0 : index
    %0 = vector.load %arg1[%c0, %c0_0] : memref<8x256xf32, #tpu.memory_space<vmem>>, vector<8x256xf32>
    %c0_1 = arith.constant 0 : index
    %1 = memref.load %arg2[%c0_1] : memref<5xf32, #tpu.memory_space<smem>>
    %c1 = arith.constant 1 : index
    %2 = memref.load %arg2[%c1] : memref<5xf32, #tpu.memory_space<smem>>
    %c2 = arith.constant 2 : index
    %3 = memref.load %arg2[%c2] : memref<5xf32, #tpu.memory_space<smem>>
    %c3 = arith.constant 3 : index
    %4 = memref.load %arg2[%c3] : memref<5xf32, #tpu.memory_space<smem>>
    %c4 = arith.constant 4 : index
    %5 = memref.load %arg2[%c4] : memref<5xf32, #tpu.memory_space<smem>>
    %6 = vector.broadcast %3 : f32 to vector<8x256xf32>
    %7 = arith.mulf %6, %0 : vector<8x256xf32>
    %c2_i32 = arith.constant 2 : i32
    %8 = tpu.dynamic_rotate %0 by %c2_i32 dim 1 : vector<8x256xf32>, i32 -> vector<8x256xf32>
    %9 = vector.broadcast %1 : f32 to vector<8x256xf32>
    %10 = arith.mulf %9, %8 : vector<8x256xf32>
    %11 = arith.addf %7, %10 : vector<8x256xf32>
    %c1_i32 = arith.constant 1 : i32
    %12 = tpu.dynamic_rotate %0 by %c1_i32 dim 1 : vector<8x256xf32>, i32 -> vector<8x256xf32>
    %13 = vector.broadcast %2 : f32 to vector<8x256xf32>
    %14 = arith.mulf %13, %12 : vector<8x256xf32>
    %15 = arith.addf %11, %14 : vector<8x256xf32>
    %c255_i32 = arith.constant 255 : i32
    %16 = tpu.dynamic_rotate %0 by %c255_i32 dim 1 : vector<8x256xf32>, i32 -> vector<8x256xf32>
    %17 = vector.broadcast %4 : f32 to vector<8x256xf32>
    %18 = arith.mulf %17, %16 : vector<8x256xf32>
    %19 = arith.addf %15, %18 : vector<8x256xf32>
    %c254_i32 = arith.constant 254 : i32
    %20 = tpu.dynamic_rotate %0 by %c254_i32 dim 1 : vector<8x256xf32>, i32 -> vector<8x256xf32>
    %21 = vector.broadcast %5 : f32 to vector<8x256xf32>
    %22 = arith.mulf %21, %20 : vector<8x256xf32>
    %23 = arith.addf %19, %22 : vector<8x256xf32>
    %c0_2 = arith.constant 0 : index
    %c0_3 = arith.constant 0 : index
    %24 = vector.load %arg3[%c0_2, %c0_3] : memref<8x256xf32, #tpu.memory_space<vmem>>, vector<8x256xf32>
    tpu.vector_store %arg3[%c0_2, %c0_3], %23 {strides = array<i32>} : memref<8x256xf32, #tpu.memory_space<vmem>>, vector<8x256xf32>,
    return
  }
  func.func @transform_0(%arg0: i32) -> (i32, i32) {
    %c0_i32 = arith.constant 0 : i32
    %c0_i32_0 = arith.constant 0 : i32
    return %arg0, %c0_i32 : i32, i32
  }
  func.func @transform_1(%arg0: i32) -> i32 {
    %c0_i32 = arith.constant 0 : i32
    %c0_i32_0 = arith.constant 0 : i32
    return %c0_i32 : i32
  }
  func.func @transform_2(%arg0: i32) -> (i32, i32) {
    %c0_i32 = arith.constant 0 : i32
    %c0_i32_0 = arith.constant 0 : i32
    return %arg0, %c0_i32 : i32, i32
  }
}

</mosaic_0001>

<bundles_post_ra>
// kernel: ode_func_im_forward.1
= control target key start
LH: loop header
LB: loop body
LE: loop exit
PB: predicated region body
PF: predicated region fallthrough
CT: control target
= control target key end

     0   :  { %7 = vsyncpa [#allocation3], 0  ;;  %s243_s0 = inlined_call_operand.hbm [shape: f32[8,256], index: 0, kind: input, shape index: {}]   ;;  %s244_s1 = inlined_call_operand.vmem [shape: f32[5], index: 1, kind: input, shape index: {}]   ;;  %s245_s2 = inlined_call_operand.hbm [shape: f32[8,256], index: 2, kind: output, shape index: {}]  }
   0x1   :  { %8 = vsyncpa [#allocation5], 0 }
   0x2   :  { %9 = vsyncpa [#allocation4], 0  ;;  %s26_s11 = sshll.u32 %s244_s1, 4  ;;  %s188_s12 = smov [#allocation2]   ;;  %s27_s11 = int_to_ptr.vmem [resolvable:$true] %s26_s11 }
   0x3   :  { %s16_s13 = sshll.u32 %s188_s12, 4  ;;  %s126_s16 = scalar_lea.hbm %s243_s0, 256  ;;  %s17_s13 = int_to_ptr.vmem [resolvable:$true] %s16_s13 }
   0x4   :  { %p127_p0 = scmp.ne.s32.totalorder %s243_s0, %s126_s16  ;;  %p130_p1 = scmp.lt.u32.totalorder %s126_s16, %s243_s0 }
   0x6   :  { %p132_p2 = pnand %p130_p1, %p127_p0 }
   0x8   :  { %135 = shalt.err (!%p132_p2)
}
   0x9   :  { %s136_s21 = scalar_lea.vmem %s17_s13, 256  ;;  %p141_p4 = scmp.lt.s32.totalorder %s17_s13, %s17_s13 }
   0xa   :  { %p137_p3 = scmp.ne.s32.totalorder %s17_s13, %s136_s21  ;;  %p142_p5 = scmp.lt.s32.totalorder %s136_s21, %s136_s21 }
   0xc   :  { %p143_p6 = por %p142_p5, %p141_p4 }
   0xe   :  { %p144_p7 = pnand %p143_p6, %p137_p3 }
  0x10   :  { %147 = shalt.err (!%p144_p7)
}
  0x11   :  { %19 = dma.hbm_to_vmem [thread:$0]  %s243_s0, 256, %s17_s13, [#allocation3]  }
  0x12   :  { %s148_s23 = scalar_lea.vmem %s27_s11, 16  ;;  %p153_p9 = scmp.lt.s32.totalorder %s27_s11, %s27_s11 }
  0x13   :  { %p149_p8 = scmp.ne.s32.totalorder %s27_s11, %s148_s23  ;;  %p154_p10 = scmp.lt.s32.totalorder %s148_s23, %s148_s23 }
  0x15   :  { %p155_p11 = por %p154_p10, %p153_p9 }
  0x17   :  { %p156_p12 = pnand %p155_p11, %p149_p8 }
  0x19   :  { %159 = shalt.err (!%p156_p12)
}
  0x1a   :  { %s189_s24 = smov [#allocation6]  }
  0x1b   :  { %29 = dma.vmem_to_smem %s27_s11, 16, %s189_s24, [#allocation5]  }
  0x1c   :  { %182 = dma.done.wait [#allocation3], 256  }
  0x1d   :  { %183 = vsyncadd [#allocation3], 4294967040 }
  0x1e   :  { %184 = dma.done.wait [#allocation5], 16  }
  0x1f   :  { %185 = vsyncadd [#allocation5], 4294967280 }
  0x20   :  { %36 = sfence }
  0x21   :  { %v37_v0 = vld [vmem:[#allocation2] sm:$0xff]  ;;  %s190_s25 = smov 1   ;;  %s191_s26 = smov 2   ;;  %v38_v1 = vld [vmem:[#allocation2 + $0x8] sm:$0xff]  ;;  %v51_v2 = vlaneseq }
  0x22   :  { %61 = vrot.lane.b32.xlu1 %v37_v0, %s190_s25  ;;  %47 = vrot.lane.b32.xlu0 %v37_v0, %s191_s26  ;;  %s192_s0 = smov 127   ;;  %s193_s27 = smov 126  }
  0x23   :  { %s116_s28 = sld [smem:[#allocation6 + $0x2]]  ;;  %s39_s29 = sld [smem:[#allocation6]]  ;;  %v52_v3 = vand.u32 127, %v51_v2 }
  0x24   :  { %s115_s30 = sld [smem:[#allocation6 + $0x1]]  ;;  %s225_s3 = sld [smem:[#allocation6 + $0x3]] }
  0x25   :  { %vm65_vm0 = vcmp.lt.s32.totalorder %v52_v3, 1  ;;  %vm53_vm1 = vcmp.lt.s32.totalorder %v52_v3, 2  ;;  %s227_s4 = sld [smem:[#allocation6 + $0x4]]  ;;  %vm77_vm2 = vcmp.lt.s32.totalorder %v52_v3, 127  ;;  %vm89_vm3 = vcmp.lt.s32.totalorder %v52_v3, 126  ;;  %s194_s5 = smov [#allocation7]  }
  0x26   :  { %63 = vrot.lane.b32.xlu1 %v38_v1, %s190_s25  ;;  %49 = vrot.lane.b32.xlu0 %v38_v1, %s191_s26  ;;  %s105_s6 = sshll.u32 %s194_s5, 4  ;;  %s106_s6 = int_to_ptr.vmem [resolvable:$true] %s105_s6 }
  0x27   :  { %s160_s7 = scalar_lea.vmem %s106_s6, 256  ;;  %p165_p0 = scmp.lt.s32.totalorder %s106_s6, %s106_s6 }
  0x28   :  { %p161_p13 = scmp.ne.s32.totalorder %s106_s6, %s160_s7  ;;  %p166_p1 = scmp.lt.s32.totalorder %s160_s7, %s160_s7 }
  0x29   :  { %v44_v6 = vstv %s116_s28  ;;  %v56_v7 = vstv %s39_s29 }
  0x2a   :  { %75 = vrot.lane.b32.xlu1 %v38_v1, %s192_s0  ;;  %73 = vrot.lane.b32.xlu0 %v37_v0, %s192_s0  ;;  %v68_v8 = vstv %s115_s30  ;;  %v46_v10 = vmul.f32 %v44_v6, %v38_v1  ;;  %v45_v12 = vmul.f32 %v44_v6, %v37_v0  ;;  %v80_v19 = vstv %s225_s3  ;;  %p167_p2 = por %p166_p1, %p165_p0 }
  0x2b   :  { %v92_v32 = vstv %s227_s4 }
  0x2c   :  { %p168_p3 = pnand %p167_p2, %p161_p13 }
  0x2e   :  { %87 = vrot.lane.b32.xlu1 %v38_v1, %s193_s27  ;;  %85 = vrot.lane.b32.xlu0 %v37_v0, %s193_s27 }
  0x94   :  { %v62_v4 = vpop.permute.xlu1 %61  ;;  %v48_v5 = vpop.permute.xlu0 %47 }
  0x98   :  { %v64_v9 = vpop.permute.xlu1 %63  ;;  %v50_v11 = vpop.permute.xlu0 %49 }
  0x99   :  { %v66_v13 = vsel %vm65_vm0, %v62_v4, %v64_v9  ;;  %v67_v14 = vsel %vm65_vm0, %v64_v9, %v62_v4  ;;  %v54_v15 = vsel %vm53_vm1, %v48_v5, %v50_v11  ;;  %v55_v16 = vsel %vm53_vm1, %v50_v11, %v48_v5 }
  0x9a   :  { %v57_v17 = vmul.f32 %v56_v7, %v55_v16  ;;  %v58_v18 = vmul.f32 %v56_v7, %v54_v15  ;;  %v69_v20 = vmul.f32 %v68_v8, %v67_v14  ;;  %v70_v21 = vmul.f32 %v68_v8, %v66_v13 }
  0x9c   :  { %v59_v22 = vadd.f32 %v57_v17, %v45_v12  ;;  %v60_v23 = vadd.f32 %v58_v18, %v46_v10  ;;  %v76_v24 = vpop.permute.xlu1 %75  ;;  %v74_v25 = vpop.permute.xlu0 %73 }
  0x9d   :  { %v78_v26 = vsel %vm77_vm2, %v74_v25, %v76_v24  ;;  %v79_v27 = vsel %vm77_vm2, %v76_v24, %v74_v25 }
  0x9e   :  { %v81_v28 = vmul.f32 %v80_v19, %v78_v26  ;;  %v82_v29 = vmul.f32 %v80_v19, %v79_v27  ;;  %v71_v30 = vadd.f32 %v69_v20, %v59_v22  ;;  %v72_v31 = vadd.f32 %v70_v21, %v60_v23 }
  0xa0   :  { %v88_v33 = vpop.permute.xlu1 %87  ;;  %v86_v34 = vpop.permute.xlu0 %85  ;;  %v83_v39 = vadd.f32 %v81_v28, %v71_v30  ;;  %v84_v40 = vadd.f32 %v82_v29, %v72_v31 }
  0xa1   :  { %v90_v35 = vsel %vm89_vm3, %v86_v34, %v88_v33  ;;  %v91_v36 = vsel %vm89_vm3, %v88_v33, %v86_v34 }
  0xa2   :  { %v93_v37 = vmul.f32 %v92_v32, %v90_v35  ;;  %v94_v38 = vmul.f32 %v92_v32, %v91_v36 }
  0xa4   :  { %v95_v41 = vadd.f32 %v93_v37, %v83_v39  ;;  %v96_v42 = vadd.f32 %v94_v38, %v84_v40 }
  0xa6   :  { %97 = vst [vmem:[#allocation7] sm:$0xff] %v95_v41  ;;  %98 = vst [vmem:[#allocation7 + $0x8] sm:$0xff] %v96_v42 }
  0xa7   :  { %171 = shalt.err (!%p168_p3)
}
  0xa8   :  { %s172_s10 = scalar_lea.hbm %s245_s2, 256 }
  0xa9   :  { %p173_p4 = scmp.ne.s32.totalorder %s245_s2, %s172_s10  ;;  %p176_p5 = scmp.lt.u32.totalorder %s172_s10, %s245_s2 }
  0xab   :  { %p178_p6 = pnand %p176_p5, %p173_p4 }
  0xad   :  { %181 = shalt.err (!%p178_p6)
}
  0xae   :  { %108 = dma.vmem_to_hbm [thread:$0]  %s106_s6, 256, %s245_s2, [#allocation4]  }
  0xaf   :  { %186 = dma.done.wait [#allocation4], 256  }
  0xb0   :  { %187 = vsyncadd [#allocation4], 4294967040 }
  0xb1   :  { %112 = vsyncpa [#allocation3], 1 }
  0xb2   :  { %113 = vsyncpa [#allocation4], 1 }
  0xb3   :  { %114 = vsyncpa [#allocation5], 1 }

</bundles_post_ra>
